<compile_context>
chip_gen: v5e
topology: v5e:2x2
jax: 0.10.0
libtpu: 0.0.40
codegen_flags: <defaults>
</compile_context>

<pallas_src>
import jax
import jax.numpy as jnp
from jax.experimental import pallas as pl
from jax.experimental.pallas import tpu as pltpu


def _round_up(v, m):
    return ((v + m - 1) // m) * m


def _cdiv(a, b):
    return (a + b - 1) // b


def outer_kernel(x_col_ref, x_row_ref, o_ref):
    # x_col_ref: (bm, f+1, 1)  x_row_ref: (bm, 1, tf)  o_ref: (bm, f+1, tf)
    # Row 0 of the column view is 1.0, so row 0 of the output slab is x itself:
    # the concat with x is fused.  Single broadcast multiply, single store.
    o_ref[...] = x_col_ref[...] * x_row_ref[...]


def _vmem_capacity_bytes():
    try:
        return int(pltpu.get_tpu_info().vmem_capacity_bytes)
    except Exception:
        # Conservative fallback: v7x has 64 MiB of VMEM per TensorCore.
        return 64 * 1024 * 1024


def _block_bytes_per_row(f, tf, dtype):
    """Double-buffered VMEM bytes per batch row for blocks (f+1,1),(1,tf),(f+1,tf)."""
    itemsize = jnp.dtype(dtype).itemsize
    sub_q = 8 * max(1, 4 // itemsize)       # sublane quantum: 8 f32 / 16 bf16 / 32 i8
    fp1_sub = _round_up(f + 1, sub_q)
    tf_lane = _round_up(tf, 128)
    col = fp1_sub * 128 * itemsize          # (f+1, 1) column view (lane-padded)
    row = sub_q * tf_lane * itemsize        # (1, tf) row view
    out = fp1_sub * tf_lane * itemsize      # (f+1, tf) output slab
    return 2 * (col + row + out)            # x2: double buffering


def _choose_tiles(b, f, dtype, budget_bytes):
    # Prefer no f-tiling (tf = f); tile the lane axis only when a single batch
    # row would not fit the budget (large f), using multiples of 128 lanes so
    # blocks stay legal and lane-dense.
    tf = f
    if _block_bytes_per_row(f, f, dtype) > budget_bytes:
        tf = 128
        while tf * 2 <= f and _block_bytes_per_row(f, tf * 2, dtype) <= budget_bytes:
            tf *= 2
    per_row = _block_bytes_per_row(f, tf, dtype)
    bm_max = max(1, budget_bytes // per_row)
    # >= 2 batch grid steps so "parallel" can shard across both v7x TCs.
    nb = max(2 if b >= 2 else 1, _cdiv(b, bm_max))
    bm = _cdiv(b, nb)
    return int(bm), int(tf)


def outer_forward(x, *, bm=None, tf=None, vmem_budget_bytes=None):
    b, f = x.shape
    cap = _vmem_capacity_bytes()
    if vmem_budget_bytes is None:
        # ~40% of physical VMEM for the double-buffered blocks, capped at 48 MiB.
        vmem_budget_bytes = min(int(cap * 0.4), 48 * 1024 * 1024)
    auto_bm, auto_tf = _choose_tiles(b, f, x.dtype, vmem_budget_bytes)
    bm = auto_bm if bm is None else int(bm)
    tf = auto_tf if tf is None else int(tf)

    nb = _cdiv(b, bm)
    nj = _cdiv(f, tf)

    # Tiny-copy views (b*(f+1) elements, negligible vs the b*f^2 output):
    # column view = [1, x] so the concat is fused; row view is plain x.
    ones = jnp.ones((b, 1), dtype=x.dtype)
    x_col = jnp.concatenate([ones, x], axis=1)[:, :, None]    # (b, f+1, 1)
    x_row = x[:, None, :]                                     # (b, 1, f)

    need = _block_bytes_per_row(f, tf, x.dtype) * bm
    vmem_limit = int(min(max(need + (4 << 20), 32 << 20), cap - (8 << 20)))

    out3 = pl.pallas_call(
        outer_kernel,
        out_shape=jax.ShapeDtypeStruct((b, f + 1, f), x.dtype),
        grid_spec=pltpu.PrefetchScalarGridSpec(
            num_scalar_prefetch=0,
            grid=(nb, nj),
            in_specs=[
                pl.BlockSpec((bm, f + 1, 1), lambda i, j: (i, 0, 0)),
                pl.BlockSpec((bm, 1, tf), lambda i, j: (i, 0, j)),
            ],
            out_specs=pl.BlockSpec((bm, f + 1, tf), lambda i, j: (i, 0, j)),
        ),
        compiler_params=pltpu.CompilerParams(
            dimension_semantics=("parallel", "parallel"),
            vmem_limit_bytes=vmem_limit,
        ),
    )(x_col, x_row)

    # Row-major collapse of (f+1, f) == concat([x, flatten(outer)]); free.
    return out3.reshape(b, (f + 1) * f)


if __name__ == "__main__":
    key = jax.random.PRNGKey(0)
    k0, k1 = jax.random.split(key)

    def ref_outer(x):
        b, f = x.shape
        return jnp.concatenate(
            [x, jnp.einsum("bi,bj->bij", x, x).reshape(b, f * f)], axis=-1
        )

    # Case 1: small features, auto tiling (nb=2 -> both v7x TCs get work).
    b, f = 20, 8
    x = jax.random.normal(k0, (b, f), dtype=jnp.float32)
    out = jax.block_until_ready(outer_forward(x))
    assert out.shape == (b, f + f * f), out.shape
    assert jnp.allclose(out, ref_outer(x), atol=1e-6, rtol=1e-6), "mismatch (auto)"

    # Case 2: batch tile that does not divide b -> exercises boundary blocks
    # (no padding / no output slice, relies on Pallas boundary masking).
    out_bm3 = jax.block_until_ready(outer_forward(x, bm=3))
    assert jnp.allclose(out_bm3, ref_outer(x), atol=1e-6, rtol=1e-6), "mismatch (bm=3)"

    # Case 3: lane-axis (f) tiling path used for large feature dims.
    b2, f2 = 4, 256
    x2 = jax.random.normal(k1, (b2, f2), dtype=jnp.float32)
    out2 = jax.block_until_ready(outer_forward(x2, tf=128))
    assert out2.shape == (b2, f2 + f2 * f2), out2.shape
    assert jnp.allclose(out2, ref_outer(x2), atol=1e-6, rtol=1e-6), "mismatch (tf=128)"

    print("KERNEL_OK")
</pallas_src>

<mosaic_0001>
module attributes {stable_mosaic.version = 11 : i64} {
  func.func @outer_kernel(%arg0: i32, %arg1: i32, %arg2: memref<10x9x1xf32, #tpu.memory_space<vmem>>, %arg3: memref<10x1x8xf32, #tpu.memory_space<vmem>>, %arg4: memref<10x9x8xf32, #tpu.memory_space<vmem>>) attributes {dimension_semantics = [#tpu.dimension_semantics<parallel>, #tpu.dimension_semantics<parallel>], iteration_bounds = array<i64: 2, 1>, scalar_prefetch = 0 : i64, scratch_operands = 0 : i64, tpu.core_type = #tpu.core_type<tc>, window_params = [{transform_indices = @transform_0, window_bounds = array<i64: 10, 9, 1>}, {transform_indices = @transform_1, window_bounds = array<i64: 10, 1, 8>}, {transform_indices = @transform_2, window_bounds = array<i64: 10, 9, 8>}]} {
    %c0 = arith.constant 0 : index
    %c0_0 = arith.constant 0 : index
    %c0_1 = arith.constant 0 : index
    %0 = vector.load %arg2[%c0, %c0_0, %c0_1] : memref<10x9x1xf32, #tpu.memory_space<vmem>>, vector<10x9x1xf32>
    %c0_2 = arith.constant 0 : index
    %c0_3 = arith.constant 0 : index
    %c0_4 = arith.constant 0 : index
    %1 = vector.load %arg3[%c0_2, %c0_3, %c0_4] : memref<10x1x8xf32, #tpu.memory_space<vmem>>, vector<10x1x8xf32>
    %2 = vector.broadcast %0 : vector<10x9x1xf32> to vector<10x9x8xf32>
    %3 = vector.broadcast %1 : vector<10x1x8xf32> to vector<10x9x8xf32>
    %4 = arith.mulf %2, %3 : vector<10x9x8xf32>
    %c0_5 = arith.constant 0 : index
    %c0_6 = arith.constant 0 : index
    %c0_7 = arith.constant 0 : index
    %5 = vector.load %arg4[%c0_5, %c0_6, %c0_7] : memref<10x9x8xf32, #tpu.memory_space<vmem>>, vector<10x9x8xf32>
    tpu.vector_store %arg4[%c0_5, %c0_6, %c0_7], %4 {strides = array<i32>} : memref<10x9x8xf32, #tpu.memory_space<vmem>>, vector<10x9x8xf32>,
    return
  }
  func.func @transform_0(%arg0: i32, %arg1: i32) -> (i32, i32, i32) {
    %c0_i32 = arith.constant 0 : i32
    %c0_i32_0 = arith.constant 0 : i32
    %c0_i32_1 = arith.constant 0 : i32
    return %arg0, %c0_i32, %c0_i32_0 : i32, i32, i32
  }
  func.func @transform_1(%arg0: i32, %arg1: i32) -> (i32, i32, i32) {
    %c0_i32 = arith.constant 0 : i32
    %c0_i32_0 = arith.constant 0 : i32
    return %arg0, %c0_i32, %arg1 : i32, i32, i32
  }
  func.func @transform_2(%arg0: i32, %arg1: i32) -> (i32, i32, i32) {
    %c0_i32 = arith.constant 0 : i32
    %c0_i32_0 = arith.constant 0 : i32
    return %arg0, %c0_i32, %arg1 : i32, i32, i32
  }
}

</mosaic_0001>

<bundles_post_ra>
// kernel: tpu_custom_call.1
= control target key start
LH: loop header
LB: loop body
LE: loop exit
PB: predicated region body
PF: predicated region fallthrough
CT: control target
= control target key end

     0   :  { %s588_s9 = smov 0   ;;  %s590_s10 = smov 0   ;;  %s708_s0 = inlined_call_operand.vmem [shape: f32[20,9,1], index: 0, kind: input, shape index: {}]   ;;  %s709_s1 = inlined_call_operand.vmem [shape: f32[20,1,8], index: 1, kind: input, shape index: {}]   ;;  %s710_s2 = inlined_call_operand.vmem [shape: f32[20,9,8], index: 2, kind: output, shape index: {}]  }
   0x1   :  { %s592_s11 = smov 0  }
   0x2 LB: > { %s24_s12 = sadd.s32 1, %s566_s10  ;;  %p501_p0 = scmp.ge.s32.totalorder %s570_s11, 1  ;;  %s570_s11 = sphi %s592_s11, %s12_s11   ;;  %s566_s10 = sphi %s590_s10, %s712_s10   ;;  %s562_s9 = sphi %s588_s9, %s711_s9  }
   0x3   : > { %p26_p1 = scmp.ge.s32.totalorder %s24_s12, 2  ;;  %p143_p2 = scmp.lt.s32.totalorder %s570_s11, 3 }
   0x5   : > { %s714_s12 = smov (%p26_p1, %s24_s12), 0  ;;  %p144_p3 = pnand %p501_p0, %p143_p2 }
   0x6   : > { %s177_s13 = smul.u32 (!%p144_p3), 10, %s562_s9 }
   0x7   : > { %147 = sbr.rel (%p144_p3) target bundleno = 183 (0xb7), region = 28 }
   0x8   : > { %p178_p4 = scmp.lt.s32.totalorder (!%p144_p3), %s177_s13, 19 }
   0xc   : > { %v572_v0 = vmov 0   ;;  %s716_s13 = smov (!%p178_p4, %s177_s13), 19  ;;  %vm382_vm0 = vcmask 64512   ;;  %vm384_vm1 = vcmask 57344  }
   0xd   : > { %537 = vset.pattern.permute.xlu2 %v572_v0  ;;  %536 = vset.pattern.permute.xlu1 %v572_v0  ;;  %s508_s14 = sshll.u32 %s716_s13, 4  ;;  %s613_s17 = scalar_lea.vmem %s709_s1, %s716_s13 }
   0xe   : > { %535 = vset.pattern.permute.xlu0 %v572_v0  ;;  %s620_s20 = scalar_lea.vmem %s708_s0, %s508_s14  ;;  %v538_v21 = vld [vmem:[%s613_s17 + $0x2] ss:$0 sm:$0xff]  ;;  %s648_s23 = scalar_lea.vmem %s710_s2, %s508_s14  ;;  %v539_v26 = vld [vmem:[%s613_s17 + $0x4] ss:$0 sm:$0xff]  ;;  %v540_v29 = vld [vmem:[%s613_s17 + $0x5] ss:$0 sm:$0xff] }
   0xf   : > { %v206_v1 = vld [vmem:[%s620_s20 + $0x20] sm:$0xff]  ;;  %v204_v2 = vld [vmem:[%s620_s20 + $0x10] sm:$0xff]  ;;  %v207_v4 = vld [vmem:[%s620_s20 + $0x28] sm:$0x1] }
  0x10   : > { %v202_v3 = vld [vmem:[%s620_s20] sm:$0xff]  ;;  %254 = vperm.xlu2 %537, %v206_v1   ;;  %244 = vperm.xlu1 %536, %v204_v2   ;;  %v205_v5 = vld [vmem:[%s620_s20 + $0x18] sm:$0x1]  ;;  %v203_v6 = vld [vmem:[%s620_s20 + $0x8] sm:$0x1] }
  0x11   : > { %234 = vperm.xlu0 %535, %v202_v3   ;;  %v210_v7 = vld [vmem:[%s620_s20 + $0x40] sm:$0xff]  ;;  %v209_v8 = vld [vmem:[%s620_s20 + $0x38] sm:$0x1]  ;;  %v208_v9 = vld [vmem:[%s620_s20 + $0x30] sm:$0xff] }
  0x12   : > { %v213_v10 = vld [vmem:[%s620_s20 + $0x58] sm:$0x1]  ;;  %v212_v11 = vld [vmem:[%s620_s20 + $0x50] sm:$0xff]  ;;  %v211_v12 = vld [vmem:[%s620_s20 + $0x48] sm:$0x1] }
  0x13   : > { %v216_v13 = vld [vmem:[%s620_s20 + $0x70] sm:$0xff]  ;;  %v215_v14 = vld [vmem:[%s620_s20 + $0x68] sm:$0x1]  ;;  %v214_v15 = vld [vmem:[%s620_s20 + $0x60] sm:$0xff] }
  0x14   : > { %v219_v16 = vld [vmem:[%s620_s20 + $0x88] sm:$0x1]  ;;  %v218_v17 = vld [vmem:[%s620_s20 + $0x80] sm:$0xff]  ;;  %v217_v18 = vld [vmem:[%s620_s20 + $0x78] sm:$0x1] }
  0x15   : > { %v221_v19 = vld [vmem:[%s620_s20 + $0x98] sm:$0x1]  ;;  %v220_v20 = vld [vmem:[%s620_s20 + $0x90] sm:$0xff]  ;;  %v541_v30 = vld [vmem:[%s613_s17 + $0x1] ss:$0 sm:$0xff] }
  0x16   : > { %v542_v31 = vld [vmem:[%s613_s17] ss:$0 sm:$0xff]  ;;  %v543_v38 = vld [vmem:[%s613_s17 + $0x7] ss:$0 sm:$0xff]  ;;  %v544_v45 = vld [vmem:[%s613_s17 + $0x8] ss:$0 sm:$0xff] }
  0x17   : > { %v545_v46 = vld [vmem:[%s613_s17 + $0x3] ss:$0 sm:$0xff]  ;;  %v546_v57 = vld [vmem:[%s613_s17 + $0x6] ss:$0 sm:$0xff]  ;;  %v547_v2 = vld [vmem:[%s613_s17 + $0x9] ss:$0 sm:$0xff] }
  0x18   : > { %259 = vperm.xlu2 %537, %v207_v4   ;;  %249 = vperm.xlu1 %536, %v205_v5  }
  0x19   : > { %239 = vperm.xlu0 %535, %v203_v6  }
  0x20   : > { %274 = vperm.xlu2 %537, %v210_v7   ;;  %269 = vperm.xlu1 %536, %v209_v8  }
  0x21   : > { %264 = vperm.xlu0 %535, %v208_v9  }
  0x28   : > { %289 = vperm.xlu2 %537, %v213_v10   ;;  %284 = vperm.xlu1 %536, %v212_v11  }
  0x29   : > { %279 = vperm.xlu0 %535, %v211_v12  }
  0x30   : > { %304 = vperm.xlu2 %537, %v216_v13   ;;  %299 = vperm.xlu1 %536, %v215_v14  }
  0x31   : > { %294 = vperm.xlu0 %535, %v214_v15  }
  0x38   : > { %319 = vperm.xlu2 %537, %v219_v16   ;;  %314 = vperm.xlu1 %536, %v218_v17  }
  0x39   : > { %309 = vperm.xlu0 %535, %v217_v18  }
  0x40   : > { %329 = vperm.xlu1 %536, %v221_v19  }
  0x41   : > { %324 = vperm.xlu0 %535, %v220_v20  }
  0x6a   : > { %v255_v22 = vpop.permute.xlu2 %254 }
  0x6b   : > { %v366_v23 = vmul.f32 %v538_v21, %v255_v22 }
  0x6d   : > { %388 = vst.msk [vmem:[%s648_s23 + $0x20] sm:$0xff] %vm382_vm0, %v366_v23 }
  0x72   : > { %v260_v24 = vpop.permute.xlu2 %259 }
  0x73   : > { %v367_v25 = vmul.f32 %v538_v21, %v260_v24 }
  0x75   : > { %389 = vst.msk [vmem:[%s648_s23 + $0x28] sm:$0x1] %vm384_vm1, %v367_v25 }
  0x7a   : > { %v275_v27 = vpop.permute.xlu2 %274 }
  0x7b   : > { %v370_v28 = vmul.f32 %v539_v26, %v275_v27 }
  0x7d   : > { %392 = vst.msk [vmem:[%s648_s23 + $0x40] sm:$0xff] %vm382_vm0, %v370_v28 }
  0x82   : > { %v290_v32 = vpop.permute.xlu2 %289  ;;  %v245_v33 = vpop.permute.xlu1 %244 }
  0x83   : > { %v373_v34 = vmul.f32 %v540_v29, %v290_v32  ;;  %v364_v35 = vmul.f32 %v541_v30, %v245_v33  ;;  %v235_v36 = vpop.permute.xlu0 %234 }
  0x84   : > { %v362_v37 = vmul.f32 %v542_v31, %v235_v36 }
  0x85   : > { %395 = vst.msk [vmem:[%s648_s23 + $0x58] sm:$0x1] %vm384_vm1, %v373_v34 }
  0x86   : > { %386 = vst.msk [vmem:[%s648_s23 + $0x10] sm:$0xff] %vm382_vm0, %v364_v35 }
  0x87   : > { %383 = vst.msk [vmem:[%s648_s23] sm:$0xff] %vm382_vm0, %v362_v37 }
  0x8a   : > { %v305_v39 = vpop.permute.xlu2 %304  ;;  %v250_v40 = vpop.permute.xlu1 %249 }
  0x8b   : > { %v376_v41 = vmul.f32 %v543_v38, %v305_v39  ;;  %v365_v42 = vmul.f32 %v541_v30, %v250_v40  ;;  %v240_v43 = vpop.permute.xlu0 %239 }
  0x8c   : > { %v363_v44 = vmul.f32 %v542_v31, %v240_v43 }
  0x8d   : > { %398 = vst.msk [vmem:[%s648_s23 + $0x70] sm:$0xff] %vm382_vm0, %v376_v41 }
  0x8e   : > { %387 = vst.msk [vmem:[%s648_s23 + $0x18] sm:$0x1] %vm384_vm1, %v365_v42 }
  0x8f   : > { %385 = vst.msk [vmem:[%s648_s23 + $0x8] sm:$0x1] %vm384_vm1, %v363_v44 }
  0x92   : > { %v320_v47 = vpop.permute.xlu2 %319  ;;  %v270_v48 = vpop.permute.xlu1 %269 }
  0x93   : > { %v379_v49 = vmul.f32 %v544_v45, %v320_v47  ;;  %v369_v50 = vmul.f32 %v545_v46, %v270_v48  ;;  %v265_v51 = vpop.permute.xlu0 %264 }
  0x94   : > { %v368_v52 = vmul.f32 %v545_v46, %v265_v51 }
  0x95   : > { %401 = vst.msk [vmem:[%s648_s23 + $0x88] sm:$0x1] %vm384_vm1, %v379_v49 }
  0x96   : > { %391 = vst.msk [vmem:[%s648_s23 + $0x38] sm:$0x1] %vm384_vm1, %v369_v50 }
  0x97   : > { %390 = vst.msk [vmem:[%s648_s23 + $0x30] sm:$0xff] %vm382_vm0, %v368_v52 }
  0x9a   : > { %v285_v53 = vpop.permute.xlu1 %284 }
  0x9b   : > { %v372_v54 = vmul.f32 %v540_v29, %v285_v53  ;;  %v280_v55 = vpop.permute.xlu0 %279 }
  0x9c   : > { %v371_v56 = vmul.f32 %v539_v26, %v280_v55 }
  0x9d   : > { %394 = vst.msk [vmem:[%s648_s23 + $0x50] sm:$0xff] %vm382_vm0, %v372_v54 }
  0x9e   : > { %393 = vst.msk [vmem:[%s648_s23 + $0x48] sm:$0x1] %vm384_vm1, %v371_v56 }
  0xa2   : > { %v300_v58 = vpop.permute.xlu1 %299 }
  0xa3   : > { %v375_v59 = vmul.f32 %v546_v57, %v300_v58  ;;  %v295_v60 = vpop.permute.xlu0 %294 }
  0xa4   : > { %v374_v61 = vmul.f32 %v546_v57, %v295_v60 }
  0xa5   : > { %397 = vst.msk [vmem:[%s648_s23 + $0x68] sm:$0x1] %vm384_vm1, %v375_v59 }
  0xa6   : > { %396 = vst.msk [vmem:[%s648_s23 + $0x60] sm:$0xff] %vm382_vm0, %v374_v61 }
  0xaa   : > { %v315_v62 = vpop.permute.xlu1 %314 }
  0xab   : > { %v378_v63 = vmul.f32 %v544_v45, %v315_v62  ;;  %v310_v0 = vpop.permute.xlu0 %309 }
  0xac   : > { %v377_v1 = vmul.f32 %v543_v38, %v310_v0 }
  0xad   : > { %400 = vst.msk [vmem:[%s648_s23 + $0x80] sm:$0xff] %vm382_vm0, %v378_v63 }
  0xae   : > { %399 = vst.msk [vmem:[%s648_s23 + $0x78] sm:$0x1] %vm384_vm1, %v377_v1 }
  0xb2   : > { %v330_v3 = vpop.permute.xlu1 %329 }
  0xb3   : > { %v381_v4 = vmul.f32 %v547_v2, %v330_v3  ;;  %v325_v5 = vpop.permute.xlu0 %324 }
  0xb4   : > { %v380_v6 = vmul.f32 %v547_v2, %v325_v5 }
  0xb5   : > { %403 = vst.msk [vmem:[%s648_s23 + $0x98] sm:$0x1] %vm384_vm1, %v381_v4 }
  0xb6   : > { %402 = vst.msk [vmem:[%s648_s23 + $0x90] sm:$0xff] %vm382_vm0, %v380_v6 }
  0xb7 PF: > { %s12_s11 = sadd.s32 1, %s570_s11   ;;  %s711_s9 = smov %s566_s10 }
  0xb8   : > { %p9_p5 = scmp.ge.s32.totalorder %s12_s11, 4   ;;  %s712_s10 = smov %s714_s12 }
  0xba   :  { %11 = sbr.rel (!%p9_p5) target bundleno = 2 (0x2), region = 61 }

</bundles_post_ra>
